<compile_context>
chip_gen: v5e
topology: v5e:2x2
jax: 0.10.0
libtpu: 0.0.40
codegen_flags: <defaults>
</compile_context>

<pallas_src>
import functools

import numpy as np
import jax
import jax.numpy as jnp
from jax.experimental import pallas as pl
from jax.experimental.pallas import tpu as pltpu

NEG = -1e30  # sentinel bias: invalid window slots / pad channels lose the max-pool


def _round_up(x, m):
    return (x + m - 1) // m * m


def _pick_batch_tile(B):
    """Rows per grid step.

    Multiple of 8 (sublane constraint), capped at 1024 rows (amortizes the
    ~0.35us per-grid-step pipeline overhead while keeping intermediates well
    inside VMEM on v5e/v6e/v7x).  Batches above 512 rows are split into an even
    number of >=2 steps so the "parallel" grid axis can shard across v7x's two
    TensorCores, with padding waste kept to <8 rows per tile.
    """
    Bp8 = _round_up(max(B, 1), 8)
    if Bp8 <= 512:
        return Bp8                           # tiny/medium batch: single step
    nsteps = 2 * pl.cdiv(Bp8, 2048)          # even #steps, <=1024 rows per step
    return _round_up(pl.cdiv(Bp8, nsteps), 8)


def _cnn_kernel(emb_ref, wconv_ref, bias_ref, fcw_ref, fcb_ref, out_ref,
                *, wslots, cpad):
    """Fused conv-all-branches/windows + ReLU/max-pool + FC.

    emb_ref  : (TB, KP)           bf16 gathered, flattened embeddings
    wconv_ref: (KP, WSLOTS*128)   bf16 Toeplitz/block conv weight
    bias_ref : (1, WSLOTS*128)    f32  conv bias (NEG on invalid/pad columns)
    fcw_ref  : (128, 128)         bf16 padded FC weight
    fcb_ref  : (1, 128)           f32  padded FC bias
    out_ref  : (TB, 128)          f32  padded logits (real ones in [:, :ntags])
    """
    # One MXU matmul computes every window of every conv branch.
    pre = jnp.dot(emb_ref[...], wconv_ref[...],
                  preferred_element_type=jnp.float32) + bias_ref[...]   # (TB, WSLOTS*128)

    # Global max-pool over the window axis: lane-aligned 128-wide column blocks.
    pooled = pre[:, :cpad]
    for t in range(1, wslots):
        pooled = jnp.maximum(pooled, pre[:, t * cpad:(t + 1) * cpad])
    feat = jnp.maximum(pooled, 0.0).astype(fcw_ref.dtype)               # ReLU, (TB, 128)

    # TODO(synk): F.dropout is identity in inference mode; training-mode RNG mask
    # is not reproduced here.
    out = jnp.dot(feat, fcw_ref[...],
                  preferred_element_type=jnp.float32) + fcb_ref[...]    # (TB, 128)
    out_ref[...] = out.astype(out_ref.dtype)


def prepare_cnn_params(params, *, emb_size, window_size, filters, filter_num, ntags,
                       weight_dtype=jnp.bfloat16):
    """One-time host-side weight re-layout (no vocab-sized tensors in the kernel)."""
    D, L = emb_size, window_size
    CPAD = 128                                # channel block = 1 MXU lane group
    WSLOTS = L - min(filters) + 1             # max #windows across branches
    N = WSLOTS * CPAD
    K = L * D
    KP = _round_up(K, 128)                    # lane-dense K (256 for this config)

    # Toeplitz/block conv weight over the flattened (L*D,) embedding layout.
    # Column layout: window slot t occupies lanes [t*128, (t+1)*128); inside a slot,
    # channels are [branch0 (O0) | branch1 (O1) | branch2 (O2) | zero pad].
    w_toep = np.zeros((KP, N), np.float32)
    bias = np.full((1, N), NEG, np.float32)
    c0 = 0
    for i, F in enumerate(filters):
        O = filter_num[i]
        w = np.asarray(params[f"conv_w{i}"], np.float32).reshape(O, F * D)
        b = np.asarray(params[f"conv_b{i}"], np.float32)
        for t in range(L - F + 1):            # valid windows only
            cols = slice(t * CPAD + c0, t * CPAD + c0 + O)
            w_toep[t * D:(t + F) * D, cols] = w.T
            bias[0, cols] = b
        c0 += O
    assert c0 <= CPAD, "total conv channels must fit one 128-lane block"

    # FC fused into one lane-dense 128x128 matmul (channel order matches torch.cat).
    fc_w = np.asarray(params["fc_w"], np.float32)             # (ntags, sum(filter_num))
    fc_b = np.asarray(params["fc_b"], np.float32)
    fcw = np.zeros((CPAD, CPAD), np.float32)
    fcw[:fc_w.shape[1], :ntags] = fc_w.T
    fcb = np.zeros((1, CPAD), np.float32)
    fcb[0, :ntags] = fc_b

    return dict(
        wv=jnp.asarray(np.asarray(params["wv"], np.float32), weight_dtype),  # (V+2, D)
        w_conv=jnp.asarray(w_toep, weight_dtype),
        bias=jnp.asarray(bias, jnp.float32),
        fcw=jnp.asarray(fcw, weight_dtype),
        fcb=jnp.asarray(fcb, jnp.float32),
        D=D, L=L, kpad=KP, cpad=CPAD, wslots=WSLOTS, ntags=ntags,
    )


def cnn_forward(inp, prep):
    """Gather embeddings, run one pallas_call tiled over the batch, slice real logits."""
    L, D = prep["L"], prep["D"]
    KP, CPAD, WSLOTS = prep["kpad"], prep["cpad"], prep["wslots"]
    ntags = prep["ntags"]
    B = inp.shape[0]
    TB = _pick_batch_tile(B)
    Bp = _round_up(B, TB)

    # Embedding lookup in the wrapper (XLA gather): (B, L) ids -> lane-dense
    # (Bp, KP) bf16 slab.  Keeps kernel VMEM independent of vocabulary size.
    emb = jnp.take(prep["wv"], inp.astype(jnp.int32), axis=0)            # (B, L, D)
    emb = emb.reshape(B, L * D)
    emb = jnp.pad(emb, ((0, Bp - B), (0, KP - L * D)))                   # (Bp, KP) bf16

    kernel = functools.partial(_cnn_kernel, wslots=WSLOTS, cpad=CPAD)

    def full(arr):
        # Grid-invariant weight operand: constant index_map, whole array resident.
        # All weights together are <0.5 MiB (vocab-independent), so default
        # double-buffering costs nothing.
        return pl.BlockSpec(arr.shape, lambda i: (0,) * arr.ndim)

    N = WSLOTS * CPAD
    flops = 2 * Bp * (KP * N + CPAD * CPAD)
    bytes_accessed = (Bp * KP * 2 + Bp * CPAD * 4                        # act in / logits out
                      + (KP * N + CPAD * CPAD) * 2 + (N + CPAD) * 4)     # one pass over weights

    out = pl.pallas_call(
        kernel,
        out_shape=jax.ShapeDtypeStruct((Bp, CPAD), jnp.float32),
        grid=(Bp // TB,),
        in_specs=[
            pl.BlockSpec((TB, KP), lambda i: (i, 0)),          # embeddings, tiled over batch
            full(prep["w_conv"]),
            full(prep["bias"]),
            full(prep["fcw"]),
            full(prep["fcb"]),
        ],
        out_specs=pl.BlockSpec((TB, CPAD), lambda i: (i, 0)),
        compiler_params=pltpu.CompilerParams(dimension_semantics=("parallel",)),
        cost_estimate=pl.CostEstimate(flops=flops, transcendentals=0,
                                      bytes_accessed=bytes_accessed),
    )(emb, prep["w_conv"], prep["bias"], prep["fcw"], prep["fcb"])
    return out[:B, :ntags]


def cnn_reference(inp, params, *, emb_size, window_size, filters, filter_num, ntags):
    """Pure-JAX f32 reference mirroring the PyTorch forward (eval mode)."""
    D, L = emb_size, window_size
    B = inp.shape[0]
    emb = jnp.take(params["wv"], inp, axis=0).reshape(B, L * D)
    feats = []
    for i, F in enumerate(filters):
        w = params[f"conv_w{i}"].reshape(filter_num[i], F * D)
        b = params[f"conv_b{i}"]
        wins = [emb[:, t * D:(t + F) * D] @ w.T + b for t in range(L - F + 1)]
        conv = jnp.stack(wins, axis=-1)                       # (B, O_i, nwin_i)
        feats.append(jnp.max(jax.nn.relu(conv), axis=-1))     # (B, O_i)
    x = jnp.concatenate(feats, axis=1)
    return x @ params["fc_w"].T + params["fc_b"]


if __name__ == "__main__":
    # Small shapes consistent with the module.
    nwords = 50              # VOCAB_SIZE
    emb_size = 32            # WORD_DIM
    window_size = 8          # MAX_SENT_LEN
    filters = [3, 4, 5]      # FILTERS
    filter_num = [8, 8, 8]   # FILTER_NUM
    ntags = 5                # CLASS_SIZE
    B = 2

    key = jax.random.PRNGKey(0)
    keys = jax.random.split(key, 10)

    params = {}
    wv = jax.random.normal(keys[0], (nwords + 2, emb_size), jnp.float32) * 0.1
    wv = wv.at[nwords + 1].set(0.0)          # padding_idx row is zero
    params["wv"] = wv
    for i, F in enumerate(filters):
        params[f"conv_w{i}"] = (
            jax.random.normal(keys[1 + 2 * i],
                              (filter_num[i], 1, emb_size * F), jnp.float32) * 0.05)
        params[f"conv_b{i}"] = (
            jax.random.normal(keys[2 + 2 * i], (filter_num[i],), jnp.float32) * 0.05)
    params["fc_w"] = jax.random.normal(keys[7], (ntags, sum(filter_num)),
                                       jnp.float32) * 0.1
    params["fc_b"] = jax.random.normal(keys[8], (ntags,), jnp.float32) * 0.1

    inp = jax.random.randint(keys[9], (B, window_size), 0, nwords + 2,
                             dtype=jnp.int32)

    prep = prepare_cnn_params(params, emb_size=emb_size, window_size=window_size,
                              filters=filters, filter_num=filter_num, ntags=ntags)
    out = cnn_forward(inp, prep)
    jax.block_until_ready(out)
    assert out.shape == (B, ntags) and out.dtype == jnp.float32

    ref = cnn_reference(inp, params, emb_size=emb_size, window_size=window_size,
                        filters=filters, filter_num=filter_num, ntags=ntags)
    max_err = float(jnp.max(jnp.abs(out - ref)))
    assert max_err < 5e-2, f"kernel/reference mismatch, max abs err = {max_err}"
    print("KERNEL_OK")
</pallas_src>

<mosaic_0001>
module attributes {stable_mosaic.version = 11 : i64} {
  func.func @_cnn_kernel(%arg0: i32, %arg1: memref<8x256xbf16, #tpu.memory_space<vmem>>, %arg2: memref<256x768xbf16, #tpu.memory_space<vmem>>, %arg3: memref<1x768xf32, #tpu.memory_space<vmem>>, %arg4: memref<128x128xbf16, #tpu.memory_space<vmem>>, %arg5: memref<1x128xf32, #tpu.memory_space<vmem>>, %arg6: memref<8x128xf32, #tpu.memory_space<vmem>>) attributes {dimension_semantics = [#tpu.dimension_semantics<parallel>], iteration_bounds = array<i64: 1>, scalar_prefetch = 0 : i64, scratch_operands = 0 : i64, tpu.core_type = #tpu.core_type<tc>, window_params = [{transform_indices = @transform_0, window_bounds = array<i64: 8, 256>}, {pipeline_mode = #tpu.pipeline_mode<synchronous>, transform_indices = @transform_1, window_bounds = array<i64: 256, 768>}, {pipeline_mode = #tpu.pipeline_mode<synchronous>, transform_indices = @transform_2, window_bounds = array<i64: 1, 768>}, {pipeline_mode = #tpu.pipeline_mode<synchronous>, transform_indices = @transform_3, window_bounds = array<i64: 128, 128>}, {pipeline_mode = #tpu.pipeline_mode<synchronous>, transform_indices = @transform_4, window_bounds = array<i64: 1, 128>}, {transform_indices = @transform_5, window_bounds = array<i64: 8, 128>}]} {
    %c0 = arith.constant 0 : index
    %c0_0 = arith.constant 0 : index
    %0 = vector.load %arg1[%c0, %c0_0] : memref<8x256xbf16, #tpu.memory_space<vmem>>, vector<8x256xbf16>
    %c0_1 = arith.constant 0 : index
    %c0_2 = arith.constant 0 : index
    %1 = vector.load %arg2[%c0_1, %c0_2] : memref<256x768xbf16, #tpu.memory_space<vmem>>, vector<256x768xbf16>
    %cst = arith.constant dense<0.000000e+00> : vector<8x768xf32>
    %2 = tpu.matmul %0, %1, %cst {dimension_numbers = #tpu.dot_dimension_numbers<[1], [0], [0], [1], [0, 0, 1, 1], [], []>} : vector<8x256xbf16>, vector<256x768xbf16>, vector<8x768xf32> -> vector<8x768xf32>
    %c0_3 = arith.constant 0 : index
    %c0_4 = arith.constant 0 : index
    %3 = vector.load %arg3[%c0_3, %c0_4] : memref<1x768xf32, #tpu.memory_space<vmem>>, vector<1x768xf32>
    %4 = vector.broadcast %3 : vector<1x768xf32> to vector<8x768xf32>
    %5 = arith.addf %2, %4 : vector<8x768xf32>
    %6 = vector.extract_strided_slice %5 {offsets = [0, 0], sizes = [8, 128], strides = [1, 1]} : vector<8x768xf32> to vector<8x128xf32>
    %7 = vector.extract_strided_slice %5 {offsets = [0, 128], sizes = [8, 128], strides = [1, 1]} : vector<8x768xf32> to vector<8x128xf32>
    %8 = arith.maximumf %6, %7 : vector<8x128xf32>
    %9 = vector.extract_strided_slice %5 {offsets = [0, 256], sizes = [8, 128], strides = [1, 1]} : vector<8x768xf32> to vector<8x128xf32>
    %10 = arith.maximumf %8, %9 : vector<8x128xf32>
    %11 = vector.extract_strided_slice %5 {offsets = [0, 384], sizes = [8, 128], strides = [1, 1]} : vector<8x768xf32> to vector<8x128xf32>
    %12 = arith.maximumf %10, %11 : vector<8x128xf32>
    %13 = vector.extract_strided_slice %5 {offsets = [0, 512], sizes = [8, 128], strides = [1, 1]} : vector<8x768xf32> to vector<8x128xf32>
    %14 = arith.maximumf %12, %13 : vector<8x128xf32>
    %15 = vector.extract_strided_slice %5 {offsets = [0, 640], sizes = [8, 128], strides = [1, 1]} : vector<8x768xf32> to vector<8x128xf32>
    %16 = arith.maximumf %14, %15 : vector<8x128xf32>
    %cst_5 = arith.constant 0.000000e+00 : f32
    %17 = vector.broadcast %cst_5 : f32 to vector<8x128xf32>
    %18 = arith.maximumf %16, %17 : vector<8x128xf32>
    %19 = arith.truncf %18 : vector<8x128xf32> to vector<8x128xbf16>
    %c0_6 = arith.constant 0 : index
    %c0_7 = arith.constant 0 : index
    %20 = vector.load %arg4[%c0_6, %c0_7] : memref<128x128xbf16, #tpu.memory_space<vmem>>, vector<128x128xbf16>
    %cst_8 = arith.constant dense<0.000000e+00> : vector<8x128xf32>
    %21 = tpu.matmul %19, %20, %cst_8 {dimension_numbers = #tpu.dot_dimension_numbers<[1], [0], [0], [1], [0, 0, 1, 1], [], []>} : vector<8x128xbf16>, vector<128x128xbf16>, vector<8x128xf32> -> vector<8x128xf32>
    %c0_9 = arith.constant 0 : index
    %c0_10 = arith.constant 0 : index
    %22 = vector.load %arg5[%c0_9, %c0_10] : memref<1x128xf32, #tpu.memory_space<vmem>>, vector<1x128xf32>
    %23 = vector.broadcast %22 : vector<1x128xf32> to vector<8x128xf32>
    %24 = arith.addf %21, %23 : vector<8x128xf32>
    %c0_11 = arith.constant 0 : index
    %c0_12 = arith.constant 0 : index
    %25 = vector.load %arg6[%c0_11, %c0_12] : memref<8x128xf32, #tpu.memory_space<vmem>>, vector<8x128xf32>
    tpu.vector_store %arg6[%c0_11, %c0_12], %24 {strides = array<i32>} : memref<8x128xf32, #tpu.memory_space<vmem>>, vector<8x128xf32>,
    return
  }
  func.func @transform_0(%arg0: i32) -> (i32, i32) {
    %c0_i32 = arith.constant 0 : i32
    %c0_i32_0 = arith.constant 0 : i32
    return %arg0, %c0_i32 : i32, i32
  }
  func.func @transform_1(%arg0: i32) -> (i32, i32) {
    %c0_i32 = arith.constant 0 : i32
    %c0_i32_0 = arith.constant 0 : i32
    %c0_i32_1 = arith.constant 0 : i32
    return %c0_i32, %c0_i32_0 : i32, i32
  }
  func.func @transform_2(%arg0: i32) -> (i32, i32) {
    %c0_i32 = arith.constant 0 : i32
    %c0_i32_0 = arith.constant 0 : i32
    %c0_i32_1 = arith.constant 0 : i32
    return %c0_i32, %c0_i32_0 : i32, i32
  }
  func.func @transform_3(%arg0: i32) -> (i32, i32) {
    %c0_i32 = arith.constant 0 : i32
    %c0_i32_0 = arith.constant 0 : i32
    %c0_i32_1 = arith.constant 0 : i32
    return %c0_i32, %c0_i32_0 : i32, i32
  }
  func.func @transform_4(%arg0: i32) -> (i32, i32) {
    %c0_i32 = arith.constant 0 : i32
    %c0_i32_0 = arith.constant 0 : i32
    %c0_i32_1 = arith.constant 0 : i32
    return %c0_i32, %c0_i32_0 : i32, i32
  }
  func.func @transform_5(%arg0: i32) -> (i32, i32) {
    %c0_i32 = arith.constant 0 : i32
    %c0_i32_0 = arith.constant 0 : i32
    return %arg0, %c0_i32 : i32, i32
  }
}

</mosaic_0001>

<bundles_post_ra>
// kernel: tpu_custom_call.1
= control target key start
LH: loop header
LB: loop body
LE: loop exit
PB: predicated region body
PF: predicated region fallthrough
CT: control target
= control target key end

     0   :  { %10 = vsyncpa [#allocation3], 0  ;;  %s1673_s0 = inlined_call_operand.hbm [shape: bf16[8,256], index: 0, kind: input, shape index: {}]   ;;  %s1674_s1 = inlined_call_operand.hbm [shape: bf16[256,768], index: 1, kind: input, shape index: {}]   ;;  %s1675_s2 = inlined_call_operand.hbm [shape: f32[1,768], index: 2, kind: input, shape index: {}]   ;;  %s1676_s3 = inlined_call_operand.hbm [shape: bf16[128,128], index: 3, kind: input, shape index: {}]   ;;  %s1677_s4 = inlined_call_operand.vmem [shape: f32[1,128], index: 4, kind: input, shape index: {}]   ;;  %s1678_s5 = inlined_call_operand.hbm [shape: f32[8,128], index: 5, kind: output, shape index: {}]  }
   0x1   :  { %11 = vsyncpa [#allocation6], 0 }
   0x2   :  { %12 = vsyncpa [#allocation9], 0  ;;  %s29_s20 = sshll.u32 %s1674_s1, 4  ;;  %s30_s20 = int_to_ptr.hbm [resolvable:$true] %s29_s20 }
   0x3   :  { %13 = vsyncpa [#allocation4], 0  ;;  %s1600_s21 = smov [#allocation5]   ;;  %s19_s25 = sshll.u32 %s1673_s0, 4  ;;  %s20_s25 = int_to_ptr.hbm [resolvable:$true] %s19_s25 }
   0x4   :  { %s31_s22 = sshll.u32 %s1600_s21, 4  ;;  %s1601_s26 = smov 384   ;;  %s32_s22 = int_to_ptr.vmem [resolvable:$true] %s31_s22 }
   0x5   :  { %s1602_s27 = smov 24   ;;  %s1603_s28 = smov [#allocation2]  }
   0x6   :  { %37 = dma.hbm_to_vmem [thread:$0]  %s30_s20, 12288, %s32_s22, [#allocation6], %s1601_s26, %s1601_s26, %s1602_s27  }
   0x7   :  { %s21_s29 = sshll.u32 %s1603_s28, 4  ;;  %s43_s7 = sshll.u32 %s1675_s2, 4  ;;  %s22_s29 = int_to_ptr.vmem [resolvable:$true] %s21_s29  ;;  %s44_s7 = int_to_ptr.hbm [resolvable:$true] %s43_s7 }
   0x8   :  { %24 = dma.hbm_to_vmem [thread:$0]  %s20_s25, 128, %s22_s29, [#allocation3]  }
   0x9   :  { %s53_s9 = sshll.u32 %s1676_s3, 4  ;;  %s1604_s10 = smov [#allocation7]   ;;  %s54_s9 = int_to_ptr.hbm [resolvable:$true] %s53_s9 }
   0xa   :  { %s45_s11 = sshll.u32 %s1604_s10, 4  ;;  %s1605_s0 = smov [#allocation8]   ;;  %s46_s11 = int_to_ptr.vmem [resolvable:$true] %s45_s11 }
   0xb   :  { %48 = dma.hbm_to_vmem [thread:$0]  %s44_s7, 96, %s46_s11, [#allocation6]  }
   0xc   :  { %s55_s12 = sshll.u32 %s1605_s0, 4  ;;  %s1606_s13 = smov 64   ;;  %s56_s12 = int_to_ptr.vmem [resolvable:$true] %s55_s12 }
   0xd   :  { %s1607_s14 = smov 4  }
   0xe   :  { %61 = dma.hbm_to_vmem [thread:$0]  %s54_s9, 1024, %s56_s12, [#allocation9], %s1606_s13, %s1606_s13, %s1607_s14  }
   0xf   :  { %1592 = dma.done.wait [#allocation3], 128  }
  0x10   :  { %1593 = vsyncadd [#allocation3], 4294967168 }
  0x11   :  { %1594 = dma.done.wait [#allocation6], 12384  }
  0x12   :  { %1595 = vsyncadd [#allocation6], 4294954912 }
  0x13   :  { %1596 = dma.done.wait [#allocation9], 1024  }
  0x14   :  { %1597 = vsyncadd [#allocation9], 4294966272  ;;  %v1112_v0 = vld [vmem:[#allocation5 + $0x150] sm:$0xf]  ;;  %v1403_v1 = vld [vmem:[#allocation5 + $0x164] sm:$0xf0] }
  0x15   :  { %v1304_v2 = vld [vmem:[#allocation5 + $0x2d0] sm:$0xf]  ;;  %v1113_v3 = vor.u32 %v1403_v1, %v1112_v0  ;;  %v1451_v4 = vld [vmem:[#allocation5 + $0x2e4] sm:$0xf0]  ;;  %v1400_v5 = vld [vmem:[#allocation5 + $0x154] sm:$0xf] }
  0x16   :  { %v1114_v6 = vld [vmem:[#allocation5 + $0x168] sm:$0xf0]  ;;  %v1305_v7 = vor.u32 %v1451_v4, %v1304_v2  ;;  %v1448_v9 = vld [vmem:[#allocation5 + $0x2d4] sm:$0xf]  ;;  %v1088_v11 = vld [vmem:[#allocation5 + $0x120] sm:$0xf] }
  0x17   :  { %v1117_v8 = vor.u32 %v1400_v5, %v1114_v6  ;;  %v1306_v10 = vld [vmem:[#allocation5 + $0x2e8] sm:$0xf0]  ;;  %678 = vmatpush.bf16.msra.mxu0 %v1113_v3  ;;  %v1397_v13 = vld [vmem:[#allocation5 + $0x134] sm:$0xf0]  ;;  %v1280_v14 = vld [vmem:[#allocation5 + $0x2a0] sm:$0xf] }
  0x18   :  { %v1309_v12 = vor.u32 %v1448_v9, %v1306_v10  ;;  %v1445_v15 = vld [vmem:[#allocation5 + $0x2b4] sm:$0xf0]  ;;  %691 = vmatpush.bf16.msra.mxu1 %v1305_v7  ;;  %v1089_v16 = vor.u32 %v1397_v13, %v1088_v11  ;;  %v1394_v18 = vld [vmem:[#allocation5 + $0x124] sm:$0xf]  ;;  %v1090_v19 = vld [vmem:[#allocation5 + $0x138] sm:$0xf0] }
  0x19   :  { %704 = vmatpush.bf16.msra.mxu2 %v1117_v8  ;;  %v1281_v17 = vor.u32 %v1445_v15, %v1280_v14  ;;  %v1442_v20 = vld [vmem:[#allocation5 + $0x2a4] sm:$0xf]  ;;  %v1093_v21 = vor.u32 %v1394_v18, %v1090_v19  ;;  %v1282_v22 = vld [vmem:[#allocation5 + $0x2b8] sm:$0xf0]  ;;  %v1064_v23 = vld [vmem:[#allocation5 + $0xf0] sm:$0xf] }
  0x1a   :  { %717 = vmatpush.bf16.msra.mxu3 %v1309_v12  ;;  %v1391_v24 = vld [vmem:[#allocation5 + $0x104] sm:$0xf0]  ;;  %v1285_v25 = vor.u32 %v1442_v20, %v1282_v22  ;;  %v1256_v26 = vld [vmem:[#allocation5 + $0x270] sm:$0xf]  ;;  %v1388_v28 = vld [vmem:[#allocation5 + $0xf4] sm:$0xf] }
  0x1b   :  { %v1439_v27 = vld [vmem:[#allocation5 + $0x284] sm:$0xf0]  ;;  %679 = vmatpush.bf16.msra.mxu0 %v1089_v16  ;;  %v1065_v29 = vor.u32 %v1391_v24, %v1064_v23  ;;  %v1066_v30 = vld [vmem:[#allocation5 + $0x108] sm:$0xf0]  ;;  %v1436_v31 = vld [vmem:[#allocation5 + $0x274] sm:$0xf] }
  0x1c   :  { %v1258_v32 = vld [vmem:[#allocation5 + $0x288] sm:$0xf0]  ;;  %692 = vmatpush.bf16.msra.mxu1 %v1281_v17  ;;  %v1257_v33 = vor.u32 %v1439_v27, %v1256_v26  ;;  %v1069_v34 = vor.u32 %v1388_v28, %v1066_v30  ;;  %v1040_v35 = vld [vmem:[#allocation5 + $0xc0] sm:$0xf]  ;;  %v1385_v36 = vld [vmem:[#allocation5 + $0xd4] sm:$0xf0] }
  0x1d   :  { %705 = vmatpush.bf16.msra.mxu2 %v1093_v21  ;;  %v1232_v37 = vld [vmem:[#allocation5 + $0x240] sm:$0xf]  ;;  %v1261_v38 = vor.u32 %v1436_v31, %v1258_v32  ;;  %v1433_v39 = vld [vmem:[#allocation5 + $0x254] sm:$0xf0]  ;;  %v1382_v40 = vld [vmem:[#allocation5 + $0xc4] sm:$0xf]  ;;  %v1041_v44 = vor.u32 %v1385_v36, %v1040_v35 }
  0x1e   :  { %718 = vmatpush.bf16.msra.mxu3 %v1285_v25  ;;  %v1042_v41 = vld [vmem:[#allocation5 + $0xd8] sm:$0xf0]  ;;  %v1430_v42 = vld [vmem:[#allocation5 + $0x244] sm:$0xf]  ;;  %v1233_v45 = vor.u32 %v1433_v39, %v1232_v37  ;;  %v1016_v47 = vld [vmem:[#allocation5 + $0x90] sm:$0xf] }
  0x1f   :  { %v1234_v43 = vld [vmem:[#allocation5 + $0x258] sm:$0xf0]  ;;  %680 = vmatpush.bf16.msra.mxu0 %v1065_v29  ;;  %v1045_v46 = vor.u32 %v1382_v40, %v1042_v41  ;;  %v1379_v48 = vld [vmem:[#allocation5 + $0xa4] sm:$0xf0]  ;;  %v1208_v49 = vld [vmem:[#allocation5 + $0x210] sm:$0xf] }
  0x20   :  { %693 = vmatpush.bf16.msra.mxu1 %v1257_v33  ;;  %v1237_v50 = vor.u32 %v1430_v42, %v1234_v43  ;;  %v1427_v51 = vld [vmem:[#allocation5 + $0x224] sm:$0xf0]  ;;  %v1376_v52 = vld [vmem:[#allocation5 + $0x94] sm:$0xf]  ;;  %v1018_v53 = vld [vmem:[#allocation5 + $0xa8] sm:$0xf0]  ;;  %v1017_v56 = vor.u32 %v1379_v48, %v1016_v47 }
  0x21   :  { %706 = vmatpush.bf16.msra.mxu2 %v1069_v34  ;;  %v1424_v54 = vld [vmem:[#allocation5 + $0x214] sm:$0xf]  ;;  %v1210_v55 = vld [vmem:[#allocation5 + $0x228] sm:$0xf0]  ;;  %v1209_v57 = vor.u32 %v1427_v51, %v1208_v49  ;;  %v1021_v58 = vor.u32 %v1376_v52, %v1018_v53  ;;  %v992_v59 = vld [vmem:[#allocation5 + $0x60] sm:$0xf] }
  0x22   :  { %719 = vmatpush.bf16.msra.mxu3 %v1261_v38  ;;  %v1373_v60 = vld [vmem:[#allocation5 + $0x74] sm:$0xf0]  ;;  %v1184_v61 = vld [vmem:[#allocation5 + $0x1e0] sm:$0xf]  ;;  %v1213_v62 = vor.u32 %v1424_v54, %v1210_v55  ;;  %v1370_v0 = vld [vmem:[#allocation5 + $0x64] sm:$0xf] }
  0x23   :  { %681 = vmatpush.bf16.msra.mxu0 %v1041_v44  ;;  %v1421_v63 = vld [vmem:[#allocation5 + $0x1f4] sm:$0xf0]  ;;  %v994_v1 = vld [vmem:[#allocation5 + $0x78] sm:$0xf0]  ;;  %v1418_v2 = vld [vmem:[#allocation5 + $0x1e4] sm:$0xf]  ;;  %v993_v4 = vor.u32 %v1373_v60, %v992_v59 }
  0x24   :  { %694 = vmatpush.bf16.msra.mxu1 %v1233_v45  ;;  %v1186_v3 = vld [vmem:[#allocation5 + $0x1f8] sm:$0xf0]  ;;  %v1185_v5 = vor.u32 %v1421_v63, %v1184_v61  ;;  %v997_v6 = vor.u32 %v1370_v0, %v994_v1  ;;  %v968_v7 = vld [vmem:[#allocation5 + $0x30] sm:$0xf]  ;;  %v1367_v8 = vld [vmem:[#allocation5 + $0x44] sm:$0xf0] }
  0x25   :  { %707 = vmatpush.bf16.msra.mxu2 %v1045_v46  ;;  %v1160_v9 = vld [vmem:[#allocation5 + $0x1b0] sm:$0xf]  ;;  %v1189_v10 = vor.u32 %v1418_v2, %v1186_v3  ;;  %v1415_v11 = vld [vmem:[#allocation5 + $0x1c4] sm:$0xf0]  ;;  %v1364_v12 = vld [vmem:[#allocation5 + $0x34] sm:$0xf]  ;;  %v969_v16 = vor.u32 %v1367_v8, %v968_v7 }
  0x26   :  { %720 = vmatpush.bf16.msra.mxu3 %v1237_v50  ;;  %v970_v13 = vld [vmem:[#allocation5 + $0x48] sm:$0xf0]  ;;  %v1412_v14 = vld [vmem:[#allocation5 + $0x1b4] sm:$0xf]  ;;  %v944_v17 = vld [vmem:[#allocation5] sm:$0xf]  ;;  %v1161_v19 = vor.u32 %v1415_v11, %v1160_v9 }
  0x27   :  { %682 = vmatpush.bf16.msra.mxu0 %v1017_v56  ;;  %v1162_v15 = vld [vmem:[#allocation5 + $0x1c8] sm:$0xf0]  ;;  %v1361_v18 = vld [vmem:[#allocation5 + $0x14] sm:$0xf0]  ;;  %v973_v20 = vor.u32 %v1364_v12, %v970_v13  ;;  %v1136_v21 = vld [vmem:[#allocation5 + $0x180] sm:$0xf] }
  0x28   :  { %695 = vmatpush.bf16.msra.mxu1 %v1209_v57  ;;  %v1409_v22 = vld [vmem:[#allocation5 + $0x194] sm:$0xf0]  ;;  %v1358_v23 = vld [vmem:[#allocation5 + $0x4] sm:$0xf]  ;;  %v1165_v24 = vor.u32 %v1412_v14, %v1162_v15  ;;  %v946_v25 = vld [vmem:[#allocation5 + $0x18] sm:$0xf0]  ;;  %v945_v31 = vor.u32 %v1361_v18, %v944_v17 }
  0x29   :  { %708 = vmatpush.bf16.msra.mxu2 %v1021_v58  ;;  %v1406_v26 = vld [vmem:[#allocation5 + $0x184] sm:$0xf]  ;;  %v1138_v27 = vld [vmem:[#allocation5 + $0x198] sm:$0xf0]  ;;  %v1120_v28 = vld [vmem:[#allocation5 + $0x158] sm:$0xf]  ;;  %v1137_v35 = vor.u32 %v1409_v22, %v1136_v21  ;;  %v949_v36 = vor.u32 %v1358_v23, %v946_v25 }
  0x2a   :  { %721 = vmatpush.bf16.msra.mxu3 %v1213_v62  ;;  %v1404_v29 = vld [vmem:[#allocation5 + $0x16c] sm:$0xf0]  ;;  %v1312_v30 = vld [vmem:[#allocation5 + $0x2d8] sm:$0xf]  ;;  %v1401_v33 = vld [vmem:[#allocation5 + $0x15c] sm:$0xf]  ;;  %v1141_v39 = vor.u32 %v1406_v26, %v1138_v27 }
  0x2b   :  { %683 = vmatpush.bf16.msra.mxu0 %v993_v4  ;;  %v1452_v32 = vld [vmem:[#allocation5 + $0x2ec] sm:$0xf0]  ;;  %v1122_v34 = vld [vmem:[#allocation5 + $0x170] sm:$0xf0]  ;;  %v1449_v37 = vld [vmem:[#allocation5 + $0x2dc] sm:$0xf]  ;;  %v1121_v40 = vor.u32 %v1404_v29, %v1120_v28 }
  0x2c   :  { %696 = vmatpush.bf16.msra.mxu1 %v1185_v5  ;;  %v1314_v38 = vld [vmem:[#allocation5 + $0x2f0] sm:$0xf0]  ;;  %v1313_v41 = vor.u32 %v1452_v32, %v1312_v30  ;;  %v1125_v42 = vor.u32 %v1401_v33, %v1122_v34  ;;  %v1096_v43 = vld [vmem:[#allocation5 + $0x128] sm:$0xf]  ;;  %v1398_v44 = vld [vmem:[#allocation5 + $0x13c] sm:$0xf0] }
  0x2d   :  { %709 = vmatpush.bf16.msra.mxu2 %v997_v6  ;;  %v1288_v45 = vld [vmem:[#allocation5 + $0x2a8] sm:$0xf]  ;;  %v1317_v46 = vor.u32 %v1449_v37, %v1314_v38  ;;  %v1446_v47 = vld [vmem:[#allocation5 + $0x2bc] sm:$0xf0]  ;;  %v1395_v48 = vld [vmem:[#allocation5 + $0x12c] sm:$0xf]  ;;  %v1097_v53 = vor.u32 %v1398_v44, %v1096_v43 }
  0x2e   :  { %722 = vmatpush.bf16.msra.mxu3 %v1189_v10  ;;  %v1098_v49 = vld [vmem:[#allocation5 + $0x140] sm:$0xf0]  ;;  %v1443_v50 = vld [vmem:[#allocation5 + $0x2ac] sm:$0xf]  ;;  %v80_v52 = vld [vmem:[#allocation2] sm:$0xff]  ;;  %v1289_v56 = vor.u32 %v1446_v47, %v1288_v45  ;;  %s1608_s15 = smov [#allocation10]  }
  0x2f   :  { %684 = vmatpush.bf16.msra.mxu0 %v969_v16  ;;  %v1290_v51 = vld [vmem:[#allocation5 + $0x2c0] sm:$0xf0]  ;;  %v192_v54 = vunpack.c.l.b16 %v80_v52  ;;  %v193_v55 = vunpack.c.h.b16 %v80_v52  ;;  %v1101_v57 = vor.u32 %v1395_v48, %v1098_v49  ;;  %v1072_v58 = vld [vmem:[#allocation5 + $0xf8] sm:$0xf]  ;;  %v1392_v59 = vld [vmem:[#allocation5 + $0x10c] sm:$0xf0] }
  0x30   :  { %697 = vmatpush.bf16.msra.mxu1 %v1161_v19  ;;  %v1264_v60 = vld [vmem:[#allocation5 + $0x278] sm:$0xf]  ;;  %v1293_v61 = vor.u32 %v1443_v50, %v1290_v51  ;;  %v1440_v62 = vld [vmem:[#allocation5 + $0x28c] sm:$0xf0]  ;;  %v1389_v63 = vld [vmem:[#allocation5 + $0xfc] sm:$0xf]  ;;  %v1073_v5 = vor.u32 %v1392_v59, %v1072_v58 }
  0x31   :  { %710 = vmatpush.bf16.msra.mxu2 %v973_v20  ;;  %v1074_v0 = vld [vmem:[#allocation5 + $0x110] sm:$0xf0]  ;;  %v1651_v1 = vpack.c.b16 %v192_v54, %v192_v54  ;;  %v1437_v2 = vld [vmem:[#allocation5 + $0x27c] sm:$0xf]  ;;  %v1653_v4 = vpack.c.b16 %v193_v55, %v193_v55  ;;  %v1265_v6 = vor.u32 %v1440_v62, %v1264_v60  ;;  %v1048_v8 = vld [vmem:[#allocation5 + $0xc8] sm:$0xf] }
  0x32   :  { %723 = vmatpush.bf16.msra.mxu3 %v1165_v24  ;;  %v1266_v3 = vld [vmem:[#allocation5 + $0x290] sm:$0xf0]  ;;  %v1077_v7 = vor.u32 %v1389_v63, %v1074_v0  ;;  %v1386_v9 = vld [vmem:[#allocation5 + $0xdc] sm:$0xf0]  ;;  %v1240_v10 = vld [vmem:[#allocation5 + $0x248] sm:$0xf] }
  0x33   :  { %685 = vmatpush.bf16.msra.mxu0 %v945_v31  ;;  %v1269_v11 = vor.u32 %v1437_v2, %v1266_v3  ;;  %v1434_v12 = vld [vmem:[#allocation5 + $0x25c] sm:$0xf0]  ;;  %v1383_v13 = vld [vmem:[#allocation5 + $0xcc] sm:$0xf]  ;;  %v1050_v14 = vld [vmem:[#allocation5 + $0xe0] sm:$0xf0]  ;;  %v1049_v17 = vor.u32 %v1386_v9, %v1048_v8 }
  0x34   :  { %698 = vmatpush.bf16.msra.mxu1 %v1137_v35  ;;  %v1431_v15 = vld [vmem:[#allocation5 + $0x24c] sm:$0xf]  ;;  %v1242_v16 = vld [vmem:[#allocation5 + $0x260] sm:$0xf0]  ;;  %v1241_v18 = vor.u32 %v1434_v12, %v1240_v10  ;;  %v1053_v19 = vor.u32 %v1383_v13, %v1050_v14  ;;  %v1024_v20 = vld [vmem:[#allocation5 + $0x98] sm:$0xf] }
  0x35   :  { %711 = vmatpush.bf16.msra.mxu2 %v949_v36  ;;  %v1380_v21 = vld [vmem:[#allocation5 + $0xac] sm:$0xf0]  ;;  %v1216_v22 = vld [vmem:[#allocation5 + $0x218] sm:$0xf]  ;;  %v1245_v23 = vor.u32 %v1431_v15, %v1242_v16  ;;  %v1377_v25 = vld [vmem:[#allocation5 + $0x9c] sm:$0xf] }
  0x36   :  { %724 = vmatpush.bf16.msra.mxu3 %v1141_v39  ;;  %686 = vmatmul.bf16.vlgmr.msra.gmra.mxu0 %v1651_v1  ;;  %v1428_v24 = vld [vmem:[#allocation5 + $0x22c] sm:$0xf0]  ;;  %v1026_v26 = vld [vmem:[#allocation5 + $0xb0] sm:$0xf0]  ;;  %v1425_v27 = vld [vmem:[#allocation5 + $0x21c] sm:$0xf]  ;;  %v1025_v29 = vor.u32 %v1380_v21, %v1024_v20 }
  0x37   :  { %730 = vmatpush.bf16.msrb.mxu0 %v1121_v40  ;;  %699 = vmatmul.bf16.vlgmr.msra.gmra.mxu1 %v1653_v4  ;;  %v1218_v28 = vld [vmem:[#allocation5 + $0x230] sm:$0xf0]  ;;  %v1217_v30 = vor.u32 %v1428_v24, %v1216_v22  ;;  %v1029_v31 = vor.u32 %v1377_v25, %v1026_v26  ;;  %v1000_v32 = vld [vmem:[#allocation5 + $0x68] sm:$0xf]  ;;  %v1374_v33 = vld [vmem:[#allocation5 + $0x7c] sm:$0xf0] }
  0x38   :  { %743 = vmatpush.bf16.msrb.mxu1 %v1313_v41  ;;  %712 = vmatmul.bf16.vlgmr.msra.gmra.mxu2 %v1651_v1  ;;  %v1192_v34 = vld [vmem:[#allocation5 + $0x1e8] sm:$0xf]  ;;  %v1221_v35 = vor.u32 %v1425_v27, %v1218_v28  ;;  %v1422_v36 = vld [vmem:[#allocation5 + $0x1fc] sm:$0xf0]  ;;  %v1371_v37 = vld [vmem:[#allocation5 + $0x6c] sm:$0xf]  ;;  %v1001_v41 = vor.u32 %v1374_v33, %v1000_v32 }
  0x39   :  { %756 = vmatpush.bf16.msrb.mxu2 %v1125_v42  ;;  %725 = vmatmul.bf16.vlgmr.msra.gmra.mxu3 %v1653_v4  ;;  %v1002_v38 = vld [vmem:[#allocation5 + $0x80] sm:$0xf0]  ;;  %v1419_v39 = vld [vmem:[#allocation5 + $0x1ec] sm:$0xf]  ;;  %v1193_v42 = vor.u32 %v1422_v36, %v1192_v34  ;;  %v976_v44 = vld [vmem:[#allocation5 + $0x38] sm:$0xf] }
  0x3a   :  { %769 = vmatpush.bf16.msrb.mxu3 %v1317_v46  ;;  %v1194_v40 = vld [vmem:[#allocation5 + $0x200] sm:$0xf0]  ;;  %v1005_v43 = vor.u32 %v1371_v37, %v1002_v38  ;;  %v1368_v45 = vld [vmem:[#allocation5 + $0x4c] sm:$0xf0]  ;;  %v1168_v46 = vld [vmem:[#allocation5 + $0x1b8] sm:$0xf] }
  0x3b   :  { %731 = vmatpush.bf16.msrb.mxu0 %v1097_v53  ;;  %v1197_v47 = vor.u32 %v1419_v39, %v1194_v40  ;;  %v1416_v48 = vld [vmem:[#allocation5 + $0x1cc] sm:$0xf0]  ;;  %v1365_v49 = vld [vmem:[#allocation5 + $0x3c] sm:$0xf]  ;;  %v978_v50 = vld [vmem:[#allocation5 + $0x50] sm:$0xf0]  ;;  %v977_v53 = vor.u32 %v1368_v45, %v976_v44 }
  0x3c   :  { %744 = vmatpush.bf16.msrb.mxu1 %v1289_v56  ;;  %v1413_v51 = vld [vmem:[#allocation5 + $0x1bc] sm:$0xf]  ;;  %v1170_v52 = vld [vmem:[#allocation5 + $0x1d0] sm:$0xf0]  ;;  %v952_v54 = vld [vmem:[#allocation5 + $0x8] sm:$0xf]  ;;  %v1169_v56 = vor.u32 %v1416_v48, %v1168_v46 }
  0x3d   :  { %757 = vmatpush.bf16.msrb.mxu2 %v1101_v57  ;;  %v1362_v55 = vld [vmem:[#allocation5 + $0x1c] sm:$0xf0]  ;;  %v981_v57 = vor.u32 %v1365_v49, %v978_v50  ;;  %v1144_v58 = vld [vmem:[#allocation5 + $0x188] sm:$0xf]  ;;  %v1359_v60 = vld [vmem:[#allocation5 + $0xc] sm:$0xf] }
  0x3e   :  { %770 = vmatpush.bf16.msrb.mxu3 %v1293_v61  ;;  %v1410_v59 = vld [vmem:[#allocation5 + $0x19c] sm:$0xf0]  ;;  %v1173_v61 = vor.u32 %v1413_v51, %v1170_v52  ;;  %v954_v62 = vld [vmem:[#allocation5 + $0x20] sm:$0xf0]  ;;  %v1407_v63 = vld [vmem:[#allocation5 + $0x18c] sm:$0xf] }
  0x3f   :  { %732 = vmatpush.bf16.msrb.mxu0 %v1073_v5  ;;  %v1146_v0 = vld [vmem:[#allocation5 + $0x1a0] sm:$0xf0]  ;;  %v1128_v2 = vld [vmem:[#allocation5 + $0x160] sm:$0xf]  ;;  %v1405_v3 = vld [vmem:[#allocation5 + $0x174] sm:$0xf0]  ;;  %v1145_v10 = vor.u32 %v1410_v59, %v1144_v58 }
  0x40   :  { %745 = vmatpush.bf16.msrb.mxu1 %v1265_v6  ;;  %v1320_v5 = vld [vmem:[#allocation5 + $0x2e0] sm:$0xf]  ;;  %v953_v6 = vor.u32 %v1362_v55, %v952_v54  ;;  %v1402_v8 = vld [vmem:[#allocation5 + $0x164] sm:$0xf]  ;;  %v1130_v9 = vld [vmem:[#allocation5 + $0x178] sm:$0xf0]  ;;  %v1149_v14 = vor.u32 %v1407_v63, %v1146_v0  ;;  %v1129_v15 = vor.u32 %v1405_v3, %v1128_v2 }
  0x41   :  { %758 = vmatpush.bf16.msrb.mxu2 %v1077_v7  ;;  %v1453_v7 = vld [vmem:[#allocation5 + $0x2f4] sm:$0xf0]  ;;  %v1450_v12 = vld [vmem:[#allocation5 + $0x2e4] sm:$0xf]  ;;  %v1322_v13 = vld [vmem:[#allocation5 + $0x2f8] sm:$0xf0] }
  0x42   :  { %771 = vmatpush.bf16.msrb.mxu3 %v1269_v11  ;;  %v957_v11 = vor.u32 %v1359_v60, %v954_v62  ;;  %v1321_v16 = vor.u32 %v1453_v7, %v1320_v5  ;;  %v1296_v20 = vld [vmem:[#allocation5 + $0x2b0] sm:$0xf]  ;;  %v1325_v21 = vor.u32 %v1450_v12, %v1322_v13  ;;  %v1447_v22 = vld [vmem:[#allocation5 + $0x2c4] sm:$0xf0]  ;;  %v1106_v24 = vld [vmem:[#allocation5 + $0x148] sm:$0xf0] }
  0x43   :  { %733 = vmatpush.bf16.msrb.mxu0 %v1049_v17  ;;  %v1133_v17 = vor.u32 %v1402_v8, %v1130_v9  ;;  %v1444_v25 = vld [vmem:[#allocation5 + $0x2b4] sm:$0xf]  ;;  %v1298_v26 = vld [vmem:[#allocation5 + $0x2c8] sm:$0xf0]  ;;  %v1080_v28 = vld [vmem:[#allocation5 + $0x100] sm:$0xf] }
  0x44   :  { %746 = vmatpush.bf16.msrb.mxu1 %v1241_v18  ;;  %v1104_v18 = vld [vmem:[#allocation5 + $0x130] sm:$0xf]  ;;  %v1272_v32 = vld [vmem:[#allocation5 + $0x280] sm:$0xf]  ;;  %v1301_v33 = vor.u32 %v1444_v25, %v1298_v26  ;;  %v1441_v34 = vld [vmem:[#allocation5 + $0x294] sm:$0xf0] }
  0x45   :  { %759 = vmatpush.bf16.msrb.mxu2 %v1053_v19  ;;  %v1399_v19 = vld [vmem:[#allocation5 + $0x144] sm:$0xf0]  ;;  %v1082_v36 = vld [vmem:[#allocation5 + $0x118] sm:$0xf0]  ;;  %v1438_v37 = vld [vmem:[#allocation5 + $0x284] sm:$0xf]  ;;  %v1273_v40 = vor.u32 %v1441_v34, %v1272_v32 }
  0x46   :  { %772 = vmatpush.bf16.msrb.mxu3 %v1245_v23  ;;  %v1396_v23 = vld [vmem:[#allocation5 + $0x134] sm:$0xf]  ;;  %v1105_v27 = vor.u32 %v1399_v19, %v1104_v18  ;;  %v1274_v38 = vld [vmem:[#allocation5 + $0x298] sm:$0xf0]  ;;  %v1248_v44 = vld [vmem:[#allocation5 + $0x250] sm:$0xf] }
  0x47   :  { %734 = vmatpush.bf16.msrb.mxu0 %v1025_v29  ;;  %v1297_v29 = vor.u32 %v1447_v22, %v1296_v20  ;;  %v1277_v45 = vor.u32 %v1438_v37, %v1274_v38  ;;  %v1435_v46 = vld [vmem:[#allocation5 + $0x264] sm:$0xf0]  ;;  %v1058_v48 = vld [vmem:[#allocation5 + $0xe8] sm:$0xf0]  ;;  %v1432_v49 = vld [vmem:[#allocation5 + $0x254] sm:$0xf] }
  0x48   :  { %747 = vmatpush.bf16.msrb.mxu1 %v1217_v30  ;;  %v1109_v30 = vor.u32 %v1396_v23, %v1106_v24  ;;  %v1250_v50 = vld [vmem:[#allocation5 + $0x268] sm:$0xf0]  ;;  %v1249_v52 = vor.u32 %v1435_v46, %v1248_v44  ;;  %v1032_v54 = vld [vmem:[#allocation5 + $0xa0] sm:$0xf]  ;;  %v1381_v55 = vld [vmem:[#allocation5 + $0xb4] sm:$0xf0] }
  0x49   :  { %760 = vmatpush.bf16.msrb.mxu2 %v1029_v31  ;;  %v1393_v31 = vld [vmem:[#allocation5 + $0x114] sm:$0xf0]  ;;  %v1378_v59 = vld [vmem:[#allocation5 + $0xa4] sm:$0xf]  ;;  %v1034_v60 = vld [vmem:[#allocation5 + $0xb8] sm:$0xf0]  ;;  %v1033_v63 = vor.u32 %v1381_v55, %v1032_v54 }
  0x4a   :  { %773 = vmatpush.bf16.msrb.mxu3 %v1221_v35  ;;  %v1390_v35 = vld [vmem:[#allocation5 + $0x104] sm:$0xf]  ;;  %v1081_v39 = vor.u32 %v1393_v31, %v1080_v28  ;;  %v1429_v58 = vld [vmem:[#allocation5 + $0x234] sm:$0xf0]  ;;  %v1226_v62 = vld [vmem:[#allocation5 + $0x238] sm:$0xf0]  ;;  %v1037_v2 = vor.u32 %v1378_v59, %v1034_v60 }
  0x4b   :  { %735 = vmatpush.bf16.msrb.mxu0 %v1001_v41  ;;  %v1085_v41 = vor.u32 %v1390_v35, %v1082_v36  ;;  %v1008_v3 = vld [vmem:[#allocation5 + $0x70] sm:$0xf]  ;;  %v1375_v5 = vld [vmem:[#allocation5 + $0x84] sm:$0xf0]  ;;  %v1372_v9 = vld [vmem:[#allocation5 + $0x74] sm:$0xf] }
  0x4c   :  { %748 = vmatpush.bf16.msrb.mxu1 %v1193_v42  ;;  %v1056_v42 = vld [vmem:[#allocation5 + $0xd0] sm:$0xf]  ;;  %v1423_v8 = vld [vmem:[#allocation5 + $0x204] sm:$0xf0]  ;;  %v1202_v12 = vld [vmem:[#allocation5 + $0x208] sm:$0xf0]  ;;  %v1009_v13 = vor.u32 %v1375_v5, %v1008_v3 }
  0x4d   :  { %761 = vmatpush.bf16.msrb.mxu2 %v1005_v43  ;;  %v1387_v43 = vld [vmem:[#allocation5 + $0xe4] sm:$0xf0]  ;;  %v1176_v18 = vld [vmem:[#allocation5 + $0x1c0] sm:$0xf]  ;;  %v1417_v20 = vld [vmem:[#allocation5 + $0x1d4] sm:$0xf0] }
  0x4e   :  { %774 = vmatpush.bf16.msrb.mxu3 %v1197_v47  ;;  %v1384_v47 = vld [vmem:[#allocation5 + $0xd4] sm:$0xf]  ;;  %v1057_v51 = vor.u32 %v1387_v43, %v1056_v42  ;;  %v986_v22 = vld [vmem:[#allocation5 + $0x58] sm:$0xf0]  ;;  %v1414_v23 = vld [vmem:[#allocation5 + $0x1c4] sm:$0xf]  ;;  %v1177_v26 = vor.u32 %v1417_v20, %v1176_v18 }
  0x4f   :  { %736 = vmatpush.bf16.msrb.mxu0 %v977_v53  ;;  %v1061_v53 = vor.u32 %v1384_v47, %v1058_v48  ;;  %v1178_v24 = vld [vmem:[#allocation5 + $0x1d8] sm:$0xf0]  ;;  %v960_v28 = vld [vmem:[#allocation5 + $0x10] sm:$0xf]  ;;  %v1411_v32 = vld [vmem:[#allocation5 + $0x1a4] sm:$0xf0] }
  0x50   :  { %749 = vmatpush.bf16.msrb.mxu1 %v1169_v56  ;;  %v1224_v56 = vld [vmem:[#allocation5 + $0x220] sm:$0xf]  ;;  %v1181_v31 = vor.u32 %v1414_v23, %v1178_v24  ;;  %v962_v34 = vld [vmem:[#allocation5 + $0x28] sm:$0xf0]  ;;  %v1408_v35 = vld [vmem:[#allocation5 + $0x194] sm:$0xf] }
  0x51   :  { %762 = vmatpush.bf16.msrb.mxu2 %v981_v57  ;;  %v1253_v57 = vor.u32 %v1432_v49, %v1250_v50  ;;  %v1225_v0 = vor.u32 %v1429_v58, %v1224_v56  ;;  %v1154_v36 = vld [vmem:[#allocation5 + $0x1a8] sm:$0xf0]  ;;  %v1461_v44 = vld [vmem:[#allocation8 + $0x38] sm:$0xff]  ;;  %v1460_v47 = vld [vmem:[#allocation8 + $0x30] sm:$0xff]  ;;  %s928_s16 = sshll.u32 %s1608_s15, 4  ;;  %s930_s19 = sshll.u32 %s1678_s5, 4  ;;  %s929_s16 = int_to_ptr.vmem [resolvable:$true] %s928_s16  ;;  %s931_s19 = int_to_ptr.hbm [resolvable:$true] %s930_s19 }
  0x52   :  { %775 = vmatpush.bf16.msrb.mxu3 %v1173_v61  ;;  %v1426_v61 = vld [vmem:[#allocation5 + $0x224] sm:$0xf]  ;;  %v1459_v49 = vld [vmem:[#allocation8 + $0x28] sm:$0xff]  ;;  %v1456_v54 = vld [vmem:[#allocation8 + $0x10] sm:$0xff] }
  0x53   :  { %737 = vmatpush.bf16.msrb.mxu0 %v953_v6  ;;  %v1200_v6 = vld [vmem:[#allocation5 + $0x1f0] sm:$0xf]  ;;  %v1229_v7 = vor.u32 %v1426_v61, %v1226_v62  ;;  %v1454_v60 = vld [vmem:[#allocation8] sm:$0xff]  ;;  %v177_v61 = vld [vmem:[#allocation7] sm:$0x3f] }
  0x54   :  { %750 = vmatpush.bf16.msrb.mxu1 %v1145_v10  ;;  %v1010_v10 = vld [vmem:[#allocation5 + $0x88] sm:$0xf0]  ;;  %v184_v20 = vperm.slane %v177_v61, 5 }
  0x55   :  { %763 = vmatpush.bf16.msrb.mxu2 %v957_v11  ;;  %v1420_v11 = vld [vmem:[#allocation5 + $0x1f4] sm:$0xf] }
  0x56   :  { %776 = vmatpush.bf16.msrb.mxu3 %v1149_v14  ;;  %738 = vmatmul.bf16.vlgmr.msrb.gmra.mxu0 %v1651_v1  ;;  %v1201_v14 = vor.u32 %v1423_v8, %v1200_v6  ;;  %v1205_v19 = vor.u32 %v1420_v11, %v1202_v12  ;;  %v181_v6 = vperm.slane %v177_v61, 2  ;;  %v183_v11 = vperm.slane %v177_v61, 4 }
  0x57   :  { %782 = vmatpush.bf16.msra.mxu0 %v1129_v15  ;;  %751 = vmatmul.bf16.vlgmr.msrb.gmra.mxu1 %v1653_v4  ;;  %v1013_v15 = vor.u32 %v1372_v9, %v1010_v10  ;;  %v182_v10 = vperm.slane %v177_v61, 3 }
  0x58   :  { %795 = vmatpush.bf16.msra.mxu1 %v1321_v16  ;;  %764 = vmatmul.bf16.vlgmr.msrb.gmra.mxu2 %v1651_v1  ;;  %v984_v16 = vld [vmem:[#allocation5 + $0x40] sm:$0xf] }
  0x59   :  { %808 = vmatpush.bf16.msra.mxu2 %v1133_v17  ;;  %777 = vmatmul.bf16.vlgmr.msrb.gmra.mxu3 %v1653_v4  ;;  %v1369_v17 = vld [vmem:[#allocation5 + $0x54] sm:$0xf0] }
  0x5a   :  { %821 = vmatpush.bf16.msra.mxu3 %v1325_v21  ;;  %v1366_v21 = vld [vmem:[#allocation5 + $0x44] sm:$0xf]  ;;  %v985_v25 = vor.u32 %v1369_v17, %v984_v16 }
  0x5b   :  { %783 = vmatpush.bf16.msra.mxu0 %v1105_v27  ;;  %v989_v27 = vor.u32 %v1366_v21, %v986_v22 }
  0x5c   :  { %796 = vmatpush.bf16.msra.mxu1 %v1297_v29  ;;  %v1363_v29 = vld [vmem:[#allocation5 + $0x24] sm:$0xf0] }
  0x5d   :  { %809 = vmatpush.bf16.msra.mxu2 %v1109_v30  ;;  %v1152_v30 = vld [vmem:[#allocation5 + $0x190] sm:$0xf]  ;;  %v961_v37 = vor.u32 %v1363_v29, %v960_v28 }
  0x5e   :  { %822 = vmatpush.bf16.msra.mxu3 %v1301_v33  ;;  %v1360_v33 = vld [vmem:[#allocation5 + $0x14] sm:$0xf]  ;;  %v1153_v38 = vor.u32 %v1411_v32, %v1152_v30 }
  0x5f   :  { %784 = vmatpush.bf16.msra.mxu0 %v1081_v39  ;;  %v965_v39 = vor.u32 %v1360_v33, %v962_v34 }
  0x60   :  { %797 = vmatpush.bf16.msra.mxu1 %v1273_v40  ;;  %v1157_v40 = vor.u32 %v1408_v35, %v1154_v36  ;;  %v1471_v35 = vld [vmem:[%s1677_s4] ss:$0 sm:$0xff] }
  0x61   :  { %810 = vmatpush.bf16.msra.mxu2 %v1085_v41 }
  0x62   :  { %823 = vmatpush.bf16.msra.mxu3 %v1277_v45 }
  0x63   :  { %785 = vmatpush.bf16.msra.mxu0 %v1057_v51 }
  0x64   :  { %798 = vmatpush.bf16.msra.mxu1 %v1249_v52  ;;  %v1458_v52 = vld [vmem:[#allocation8 + $0x20] sm:$0xff] }
  0x65   :  { %811 = vmatpush.bf16.msra.mxu2 %v1061_v53  ;;  %v1457_v53 = vld [vmem:[#allocation8 + $0x18] sm:$0xff] }
  0x66   :  { %824 = vmatpush.bf16.msra.mxu3 %v1253_v57  ;;  %v1455_v57 = vld [vmem:[#allocation8 + $0x8] sm:$0xff] }
  0x67   :  { %786 = vmatpush.bf16.msra.mxu0 %v1033_v63 }
  0x68   :  { %799 = vmatpush.bf16.msra.mxu1 %v1225_v0  ;;  %v179_v0 = vperm.slane %v177_v61, 0 }
  0x69   :  { %812 = vmatpush.bf16.msra.mxu2 %v1037_v2  ;;  %v180_v2 = vperm.slane %v177_v61, 1 }
  0x6a   :  { %825 = vmatpush.bf16.msra.mxu3 %v1229_v7 }
  0x6b   :  { %787 = vmatpush.bf16.msra.mxu0 %v1009_v13 }
  0x6c   :  { %800 = vmatpush.bf16.msra.mxu1 %v1201_v14 }
  0x6d   :  { %813 = vmatpush.bf16.msra.mxu2 %v1013_v15 }
  0x6e   :  { %826 = vmatpush.bf16.msra.mxu3 %v1205_v19 }
  0x6f   :  { %788 = vmatpush.bf16.msra.mxu0 %v985_v25 }
  0x70   :  { %801 = vmatpush.bf16.msra.mxu1 %v1177_v26 }
  0x71   :  { %814 = vmatpush.bf16.msra.mxu2 %v989_v27 }
  0x72   :  { %827 = vmatpush.bf16.msra.mxu3 %v1181_v31 }
  0x73   :  { %789 = vmatpush.bf16.msra.mxu0 %v961_v37 }
  0x74   :  { %802 = vmatpush.bf16.msra.mxu1 %v1153_v38 }
  0x75   :  { %815 = vmatpush.bf16.msra.mxu2 %v965_v39 }
  0x76   :  { %828 = vmatpush.bf16.msra.mxu3 %v1157_v40  ;;  %790 = vmatmul.bf16.vlgmr.msra.gmra.mxu0 %v1651_v1 }
  0x77   :  { %803 = vmatmul.bf16.vlgmr.msra.gmra.mxu1 %v1653_v4  ;;  %909 = vmatpush.bf16.msrb.mxu0 %v1461_v44 }
  0x78   :  { %816 = vmatmul.bf16.vlgmr.msra.gmra.mxu2 %v1651_v1 }
  0x79   :  { %829 = vmatmul.bf16.vlgmr.msra.gmra.mxu3 %v1653_v4 }
  0x7b   :  { %910 = vmatpush.bf16.msrb.mxu0 %v1460_v47 }
  0x7f   :  { %911 = vmatpush.bf16.msrb.mxu0 %v1459_v49 }
  0x83   :  { %912 = vmatpush.bf16.msrb.mxu0 %v1458_v52 }
  0x87   :  { %913 = vmatpush.bf16.msrb.mxu0 %v1457_v53 }
  0x8b   :  { %914 = vmatpush.bf16.msrb.mxu0 %v1456_v54 }
  0x8f   :  { %915 = vmatpush.bf16.msrb.mxu0 %v1455_v57 }
  0x93   :  { %916 = vmatpush.bf16.msrb.mxu0 %v1454_v60 }
  0xb3   :  { %v687_v41 = vpop.f32.mrf.mxu0 }
  0xb4   :  { %v700_v42 = vpop.f32.mrf.mxu1  ;;  %v688_v3 = vadd.f32 %v687_v41, %v179_v0 }
  0xb6   :  { %v701_v7 = vadd.f32 %v700_v42, %v688_v3 }
  0xbb   :  { %v713_v43 = vpop.f32.mrf.mxu2  ;;  %v689_v46 = vpop.f32.mrf.mxu0 }
  0xbc   :  { %v726_v45 = vpop.f32.mrf.mxu3  ;;  %v702_v48 = vpop.f32.mrf.mxu1  ;;  %v714_v5 = vadd.f32 %v713_v43, %v180_v2 }
  0xbe   :  { %v727_v8 = vadd.f32 %v726_v45, %v714_v5 }
  0xc0   :  { %v834_v12 = vmax.f32 %v701_v7, %v727_v8 }
  0xc3   :  { %v715_v50 = vpop.f32.mrf.mxu2 }
  0xc4   :  { %v728_v51 = vpop.f32.mrf.mxu3 }
  0xd3   :  { %v739_v1 = vpop.f32.mrf.mxu0 }
  0xd4   :  { %v752_v4 = vpop.f32.mrf.mxu1  ;;  %v740_v9 = vadd.f32 %v739_v1, %v181_v6 }
  0xd6   :  { %v753_v13 = vadd.f32 %v752_v4, %v740_v9 }
  0xd8   :  { %v835_v18 = vmax.f32 %v834_v12, %v753_v13 }
  0xdb   :  { %v765_v55 = vpop.f32.mrf.mxu2  ;;  %v741_v58 = vpop.f32.mrf.mxu0 }
  0xdc   :  { %v778_v56 = vpop.f32.mrf.mxu3  ;;  %v754_v59 = vpop.f32.mrf.mxu1  ;;  %v766_v14 = vadd.f32 %v765_v55, %v182_v10 }
  0xde   :  { %v779_v19 = vadd.f32 %v778_v56, %v766_v14 }
  0xe0   :  { %v836_v23 = vmax.f32 %v835_v18, %v779_v19 }
  0xe3   :  { %v767_v62 = vpop.f32.mrf.mxu2 }
  0xe4   :  { %v780_v63 = vpop.f32.mrf.mxu3 }
  0xf3   :  { %v791_v15 = vpop.f32.mrf.mxu0 }
  0xf4   :  { %v804_v16 = vpop.f32.mrf.mxu1  ;;  %v792_v17 = vadd.f32 %v791_v15, %v183_v11 }
  0xf6   :  { %v805_v21 = vadd.f32 %v804_v16, %v792_v17 }
  0xf8   :  { %v837_v28 = vmax.f32 %v836_v23, %v805_v21 }
  0xfb   :  { %v817_v22 = vpop.f32.mrf.mxu2  ;;  %v793_v26 = vpop.f32.mrf.mxu0 }
  0xfc   :  { %v818_v24 = vadd.f32 %v817_v22, %v184_v20  ;;  %v830_v25 = vpop.f32.mrf.mxu3  ;;  %v806_v27 = vpop.f32.mrf.mxu1 }
  0xfe   :  { %v831_v29 = vadd.f32 %v830_v25, %v818_v24 }
 0x100   :  { %v838_v30 = vmax.f32 %v837_v28, %v831_v29 }
 0x102   :  { %v839_v31 = vmax.f32 %v838_v30, 0.0 }
 0x103   :  { %v819_v32 = vpop.f32.mrf.mxu2 }
 0x104   :  { %v840_v33 = vpack.c.bf16 %v839_v31, %v839_v31  ;;  %v832_v34 = vpop.f32.mrf.mxu3 }
 0x106   :  { %917 = vmatmul.bf16.vlgmr.msrb.gmra.mxu0 %v840_v33 }
 0x183   :  { %v918_v36 = vpop.f32.mrf.mxu0 }
 0x184   :  { %v919_v37 = vadd.f32 %v1471_v35, %v918_v36 }
 0x186   :  { %922 = vst [vmem:[#allocation10] sm:$0xff] %v919_v37 }
 0x187   :  { %933 = dma.vmem_to_hbm [thread:$0]  %s929_s16, 128, %s931_s19, [#allocation4]  }
 0x18b   :  { %v920_v38 = vpop.f32.mrf.mxu0 }
 0x18c   :  { %1598 = dma.done.wait [#allocation4], 128  }
 0x18d   :  { %1599 = vsyncadd [#allocation4], 4294967168 }
 0x18e   :  { %938 = vsyncpa [#allocation3], 1 }
 0x18f   :  { %939 = vsyncpa [#allocation6], 1 }
 0x190   :  { %940 = vsyncpa [#allocation9], 1 }
 0x191   :  { %941 = vsyncpa [#allocation4], 1 }

</bundles_post_ra>
